<compile_context>
chip_gen: v7x
topology: tpu7x:2x2x1
jax: 0.10.0
libtpu: 0.0.40
codegen_flags: <defaults>
</compile_context>

<pallas_src>
import functools

import jax
import jax.numpy as jnp
from jax import lax
from jax.experimental import pallas as pl
from jax.experimental.pallas import tpu as pltpu

_LANE = 128
_VMEM_LIMIT = 32 * 1024 * 1024
_FUSED_BUDGET = 16 << 20  # bytes of VMEM we allow the fused block (incl. double-buffering)


def _round_up(v, m):
    return (v + m - 1) // m * m


def _sublane(dtype):
    return {4: 8, 2: 16, 1: 32}.get(jnp.dtype(dtype).itemsize, 8)


# ---------------------------- Fused single-pass kernel ----------------------------

def _fused_kernel(x_ref, o_ref, *, inv_hw):
    # x_ref/o_ref: (G, C, HW) block, G complete batches resident.
    x = x_ref[...]
    gap = jnp.sum(x.astype(jnp.float32), axis=-1, keepdims=True) * inv_hw   # (G, C, 1)
    m = jnp.max(gap, axis=1, keepdims=True)                                 # (G, 1, 1)
    e = jnp.exp(gap - m)
    denom = jnp.sum(e, axis=1, keepdims=True)
    scale = e / denom + 1.0                                                 # (G, C, 1) f32
    o_ref[...] = (x * scale.astype(x.dtype)).astype(o_ref.dtype)


# ---------------------------- Two-pass fallback kernels ----------------------------

def _sum_kernel(x_ref, s_ref, acc_ref, *, tl, hw, mask_lanes):
    # x_ref: (TR, TL) tile of the (B*C, HW) slab; s_ref/acc_ref: (TR, 1) f32.
    k = pl.program_id(1)

    @pl.when(k == 0)
    def _():
        acc_ref[...] = jnp.zeros_like(acc_ref)

    xv = x_ref[...].astype(jnp.float32)
    if mask_lanes:
        # Ragged last HW tile: out-of-bounds lanes hold garbage -> zero them out.
        col = k * tl + lax.broadcasted_iota(jnp.int32, xv.shape, 1)
        xv = jnp.where(col < hw, xv, 0.0)
    acc_ref[...] += jnp.sum(xv, axis=-1, keepdims=True)

    @pl.when(k == pl.num_programs(1) - 1)
    def _():
        s_ref[...] = acc_ref[...]


def _apply_kernel(scale_ref, x_ref, o_ref):
    # scale_ref: (TR, 1) in x.dtype (already 1 + A); x_ref/o_ref: (TR, TL).
    o_ref[...] = (x_ref[...] * scale_ref[...]).astype(o_ref.dtype)


def _pem_two_pass(x3, B, C, HW, target_block_bytes):
    dtype = x3.dtype
    itemsize = jnp.dtype(dtype).itemsize
    sub = _sublane(dtype)
    R = B * C
    x2 = x3.reshape(R, HW)

    # Row tile: dtype-aware sublane multiple, split so megacore gets >= 2 row blocks.
    if R <= sub:
        tr = R  # block == full dim (always legal, even if not a multiple of 8)
    else:
        r_units = _round_up(R, sub)
        tr = min(256, _round_up(max(1, r_units // 2), sub))
    grid_r = -(-R // tr)

    # Lane tile: whole row if it fits the target block, else a multiple of 128 with a
    # masked ragged remainder (no jnp.pad, no output slice).
    hw128 = _round_up(HW, _LANE)
    tl_want = _round_up(max(_LANE, target_block_bytes // max(1, tr * itemsize)), _LANE)
    tl = HW if hw128 <= tl_want else tl_want
    grid_hw = -(-HW // tl)
    mask_lanes = (HW % tl) != 0

    # ---- Pass 1: per-(b, c) spatial sums, accumulated in a VMEM scratch. ----
    sums = pl.pallas_call(
        functools.partial(_sum_kernel, tl=tl, hw=HW, mask_lanes=mask_lanes),
        out_shape=jax.ShapeDtypeStruct((R, 1), jnp.float32),
        grid_spec=pltpu.PrefetchScalarGridSpec(
            num_scalar_prefetch=0,
            grid=(grid_r, grid_hw),
            in_specs=[pl.BlockSpec((tr, tl), lambda r, k: (r, k))],
            out_specs=pl.BlockSpec((tr, 1), lambda r, k: (r, 0)),
            scratch_shapes=[pltpu.VMEM((tr, 1), jnp.float32)],
        ),
        compiler_params=pltpu.CompilerParams(
            dimension_semantics=("parallel", "arbitrary"),
            vmem_limit_bytes=_VMEM_LIMIT,
        ),
    )(x2)

    # ---- Tiny (B, C) softmax in plain XLA; scale kept in x.dtype. ----
    gap = sums[:, 0].reshape(B, C) * jnp.float32(1.0 / HW)
    attn = jax.nn.softmax(gap, axis=1)
    scale = (attn + 1.0).reshape(R, 1).astype(dtype)

    # ---- Pass 2: elementwise apply, both axes parallel, ragged edges write-dropped. ----
    out2 = pl.pallas_call(
        _apply_kernel,
        out_shape=jax.ShapeDtypeStruct((R, HW), dtype),
        grid_spec=pltpu.PrefetchScalarGridSpec(
            num_scalar_prefetch=0,
            grid=(grid_r, grid_hw),
            in_specs=[
                pl.BlockSpec((tr, 1), lambda r, k: (r, 0)),
                pl.BlockSpec((tr, tl), lambda r, k: (r, k)),
            ],
            out_specs=pl.BlockSpec((tr, tl), lambda r, k: (r, k)),
        ),
        compiler_params=pltpu.CompilerParams(
            dimension_semantics=("parallel", "parallel"),
            vmem_limit_bytes=_VMEM_LIMIT,
        ),
    )(scale, x2)
    return out2.reshape(B, C, HW)


# ---------------------------- Public entry point ----------------------------

def pem_forward(x, *, target_block_bytes=4 << 20, force_two_pass=False):
    """x: (B, C, H, W) -> (B, C, H, W), out = x * (1 + softmax_c(mean_hw(x)))."""
    B, C, H, W = x.shape
    HW = H * W
    dtype = x.dtype
    itemsize = jnp.dtype(dtype).itemsize
    sub = _sublane(dtype)

    x3 = x.reshape(B, C, HW)  # free reshape (contiguous trailing dims)

    # VMEM footprint of one batch's (C, HW) tile in the fused kernel:
    # double-buffered input + output in x.dtype plus one f32 intermediate, with the
    # (sublane, lane) layout padding included.
    c_pad = _round_up(C, sub)
    hw_pad = _round_up(HW, _LANE)
    per_batch_bytes = c_pad * hw_pad * (4 * itemsize + 4)

    if (not force_two_pass) and per_batch_bytes <= _FUSED_BUDGET:
        # Largest group of COMPLETE batches that fits the budget; prefer >= 2 grid
        # steps so both v7x TensorCores get work (harmless on v5e/v6e).
        g_cap = max(1, _FUSED_BUDGET // per_batch_bytes)
        divisors = [g for g in range(1, min(B, g_cap) + 1) if B % g == 0]
        pref = [g for g in divisors if B // g >= 2]
        G = max(pref) if pref else max(divisors)

        out3 = pl.pallas_call(
            functools.partial(_fused_kernel, inv_hw=1.0 / float(HW)),
            out_shape=jax.ShapeDtypeStruct((B, C, HW), dtype),
            grid_spec=pltpu.PrefetchScalarGridSpec(
                num_scalar_prefetch=0,
                grid=(B // G,),
                in_specs=[pl.BlockSpec((G, C, HW), lambda b: (b, 0, 0))],
                out_specs=pl.BlockSpec((G, C, HW), lambda b: (b, 0, 0)),
            ),
            compiler_params=pltpu.CompilerParams(
                dimension_semantics=("parallel",),
                vmem_limit_bytes=_VMEM_LIMIT,
            ),
        )(x3)
        return out3.reshape(B, C, H, W)

    # Fallback for very large per-batch activations.
    return _pem_two_pass(x3, B, C, HW, target_block_bytes).reshape(B, C, H, W)


# ---------------------------- Reference & tests ----------------------------

def _reference(x):
    xf = x.astype(jnp.float32)
    gap = jnp.mean(xf, axis=(2, 3))                          # (B, C)
    a = jax.nn.softmax(gap, axis=1)[:, :, None, None]        # (B, C, 1, 1)
    return xf * a + xf


if __name__ == "__main__":
    key = jax.random.PRNGKey(0)
    kx1, kx2, kx3, kx4, kw = jax.random.split(key, 5)

    B, C, H, W = 2, 4, 16, 16
    x = jax.random.normal(kx1, (B, C, H, W), dtype=jnp.float32)

    # Deterministic init of the (unused) self.fc = Conv2d(C, C, kernel_size=1).
    fc_weight = jax.random.normal(kw, (C, C, 1, 1), dtype=jnp.float32) * 0.02
    fc_bias = jnp.zeros((C,), dtype=jnp.float32)
    # TODO(synk): self.fc is declared in __init__ but never applied in the PyTorch forward(); kept only to mirror __init__.

    out = pem_forward(x)
    jax.block_until_ready(out)
    assert jnp.allclose(out, _reference(x), atol=1e-5, rtol=1e-5), "mismatch (fused, aligned)"

    # Unaligned C and H*W (fused path, lane extent < 128).
    x_odd = jax.random.normal(kx2, (2, 3, 10, 10), dtype=jnp.float32)
    out_odd = pem_forward(x_odd)
    jax.block_until_ready(out_odd)
    assert jnp.allclose(out_odd, _reference(x_odd), atol=1e-5, rtol=1e-5), "mismatch (fused, unaligned)"

    # Force the two-pass fallback with tiny blocks: exercises ragged row/lane edge
    # blocks, the in-kernel OOB lane mask and the VMEM scratch accumulator.
    x_tp = jax.random.normal(kx3, (2, 5, 12, 12), dtype=jnp.float32)
    out_tp = pem_forward(x_tp, target_block_bytes=4096, force_two_pass=True)
    jax.block_until_ready(out_tp)
    assert jnp.allclose(out_tp, _reference(x_tp), atol=1e-5, rtol=1e-5), "mismatch (two-pass fallback)"

    # bf16 input: dtype-aware tiling, f32 GAP/softmax, multiply kept in bf16.
    x_bf = jax.random.normal(kx4, (2, 4, 16, 16), dtype=jnp.bfloat16)
    out_bf = pem_forward(x_bf)
    jax.block_until_ready(out_bf)
    assert jnp.allclose(out_bf.astype(jnp.float32), _reference(x_bf), atol=5e-2, rtol=5e-2), "mismatch (bf16)"

    print("KERNEL_OK")
</pallas_src>

<mosaic_0001>
module attributes {stable_mosaic.version = 11 : i64} {
  func.func @_fused_kernel(%arg0: i32, %arg1: memref<1x4x256xf32, #tpu.memory_space<vmem>>, %arg2: memref<1x4x256xf32, #tpu.memory_space<vmem>>) attributes {dimension_semantics = [#tpu.dimension_semantics<parallel>], iteration_bounds = array<i64: 2>, scalar_prefetch = 0 : i64, scratch_operands = 0 : i64, tpu.core_type = #tpu.core_type<tc>, window_params = [{transform_indices = @transform_0, window_bounds = array<i64: 1, 4, 256>}, {transform_indices = @transform_1, window_bounds = array<i64: 1, 4, 256>}]} {
    %c0 = arith.constant 0 : index
    %c0_0 = arith.constant 0 : index
    %c0_1 = arith.constant 0 : index
    %0 = vector.load %arg1[%c0, %c0_0, %c0_1] : memref<1x4x256xf32, #tpu.memory_space<vmem>>, vector<1x4x256xf32>
    %cst = arith.constant dense<0.000000e+00> : vector<1x4xf32>
    %1 = vector.multi_reduction <add>, %0, %cst [2] : vector<1x4x256xf32> to vector<1x4xf32>
    %2 = vector.shape_cast %1 : vector<1x4xf32> to vector<1x4x1xf32>
    %cst_2 = arith.constant 3.906250e-03 : f32
    %3 = vector.broadcast %cst_2 : f32 to vector<1x4x1xf32>
    %4 = arith.mulf %2, %3 : vector<1x4x1xf32>
    %cst_3 = arith.constant dense<0xFF800000> : vector<1x1xf32>
    %5 = vector.multi_reduction <maximumf>, %4, %cst_3 [1] : vector<1x4x1xf32> to vector<1x1xf32>
    %6 = vector.shape_cast %5 : vector<1x1xf32> to vector<1x1x1xf32>
    %7 = vector.broadcast %6 : vector<1x1x1xf32> to vector<1x4x1xf32>
    %8 = arith.subf %4, %7 : vector<1x4x1xf32>
    %9 = math.exp %8 : vector<1x4x1xf32>
    %cst_4 = arith.constant dense<0.000000e+00> : vector<1x1xf32>
    %10 = vector.multi_reduction <add>, %9, %cst_4 [1] : vector<1x4x1xf32> to vector<1x1xf32>
    %11 = vector.shape_cast %10 : vector<1x1xf32> to vector<1x1x1xf32>
    %12 = vector.broadcast %11 : vector<1x1x1xf32> to vector<1x4x1xf32>
    %13 = arith.divf %9, %12 : vector<1x4x1xf32>
    %cst_5 = arith.constant 1.000000e+00 : f32
    %14 = vector.broadcast %cst_5 : f32 to vector<1x4x1xf32>
    %15 = arith.addf %13, %14 : vector<1x4x1xf32>
    %16 = vector.broadcast %15 : vector<1x4x1xf32> to vector<1x4x256xf32>
    %17 = arith.mulf %0, %16 : vector<1x4x256xf32>
    %c0_6 = arith.constant 0 : index
    %c0_7 = arith.constant 0 : index
    %c0_8 = arith.constant 0 : index
    %18 = vector.load %arg2[%c0_6, %c0_7, %c0_8] : memref<1x4x256xf32, #tpu.memory_space<vmem>>, vector<1x4x256xf32>
    tpu.vector_store %arg2[%c0_6, %c0_7, %c0_8], %17 {strides = array<i32>} : memref<1x4x256xf32, #tpu.memory_space<vmem>>, vector<1x4x256xf32>,
    return
  }
  func.func @transform_0(%arg0: i32) -> (i32, i32, i32) {
    %c0_i32 = arith.constant 0 : i32
    %c0_i32_0 = arith.constant 0 : i32
    %c0_i32_1 = arith.constant 0 : i32
    return %arg0, %c0_i32, %c0_i32_0 : i32, i32, i32
  }
  func.func @transform_1(%arg0: i32) -> (i32, i32, i32) {
    %c0_i32 = arith.constant 0 : i32
    %c0_i32_0 = arith.constant 0 : i32
    %c0_i32_1 = arith.constant 0 : i32
    return %arg0, %c0_i32, %c0_i32_0 : i32, i32, i32
  }
}

</mosaic_0001>

<bundles_post_ra>
// kernel: tpu_custom_call.1
= control target key start
LH: loop header
LB: loop body
LE: loop exit
PB: predicated region body
PF: predicated region fallthrough
CT: control target
= control target key end

     0   :  { %6 = vsyncpa [#allocation3], 0  ;;  %s608_s0 = inlined_call_operand.hbm [shape: f32[2,4,256], index: 0, kind: input, shape index: {}]   ;;  %s609_s1 = inlined_call_operand.hbm [shape: f32[2,4,256], index: 1, kind: output, shape index: {}]  }
   0x1   :  { %8 = vsyncpa [#allocation3 + $0x1], 0 }
   0x2   :  { %9 = vsyncpa [#allocation4], 0 }
   0x3   :  { %11 = vsyncpa [#allocation4 + $0x1], 0  ;;  %s439_s6 = smov 0   ;;  %s441_s7 = smov 0  }
   0x4   :  { %s443_s8 = smov 0   ;;  %s445_s9 = smov 0  }
   0x5 LB: > { %s460_s10 = sadd.s32 4294967295, %s424_s9   ;;  %s260_s11 = sadd.s32 4294967294, %s424_s9   ;;  %s424_s9 = sphi %s445_s9, %s624_s9   ;;  %s420_s8 = sphi %s443_s8, %s623_s8   ;;  %s416_s7 = sphi %s441_s7, %s622_s7   ;;  %s412_s6 = sphi %s439_s6, %s621_s6  }
   0x6   : > { %s464_s12 = sadd.s32 1, %s424_s9   ;;  %s24_s13 = sadd.s32 1, %s420_s8 }
   0x7   : > { %s21_s14 = ssub.s32 %s424_s9, %s464_s12  ;;  %p31_p0 = scmp.ne.s32.totalorder %s420_s8, %s416_s7 }
   0x8   : > { %p22_p1 = scmp.eq.s32.totalorder %s21_s14, 0  ;;  %p32_p2 = scmp.eq.s32.totalorder %s424_s9, 0 }
   0x9   : > { %p37_p3 = scmp.ne.s32.totalorder %s416_s7, %s412_s6  ;;  %p38_p4 = scmp.eq.s32.totalorder %s460_s10, 0 }
   0xa   : > { %s476_s15 = scalar_select %p22_p1, %s420_s8, %s24_s13  }
   0xb   : > { %p478_p5 = por %p32_p2, %p31_p0  ;;  %p482_p6 = por %p38_p4, %p37_p3 }
   0xc   : > { %p61_p7 = scmp.eq.s32.totalorder %s460_s10, 1  ;;  %p67_p8 = scmp.eq.s32.totalorder %s260_s11, 1 }
   0xd   : > { %p288_p10 = scmp.lt.s32.totalorder %s424_s9, 2  ;;  %s87_s20 = sand.u32 1, %s420_s8  }
   0xe   : > { %p489_p11 = por %p61_p7, %p31_p0  ;;  %p493_p12 = por %p67_p8, %p37_p3 }
   0xf   : > { %s274_s21 = sshll.u32 %s424_s9, 7  ;;  %s263_s22 = sshll.u32 %s87_s20, 3 }
  0x10   : > { %s613_s18 = scalar_select %p489_p11, 1, 0 }
  0x11   : > { %s614_s19 = scalar_select %p493_p12, 1, 0 }
  0x12   : > { %s502_s25 = scalar_lea.hbm %s608_s0, %s274_s21  ;;  %s91_s26 = scalar_lea.vmem [#allocation2], %s263_s22 }
  0x13   : > { %s99_s27 = sshll.u32 %s91_s26, 4  ;;  %p506_p13 = pnand %p288_p10, %p478_p5  ;;  %s510_s27 = int_to_ptr.vmem [resolvable:$true] %s99_s27 }
  0x14   : > { %s88_s29 = scalar_lea.sflag [#allocation3], %s87_s20  ;;  %s328_s30 = scalar_lea.hbm %s502_s25, 128 }
  0x15   : > { %p329_p2 = scmp.ne.s32.totalorder %s502_s25, %s328_s30  ;;  %p330_p3 = pneg %p506_p13 }
  0x16   : > { %s333_s4 = scalar_lea.hbm %s608_s0, 256  ;;  %p334_p5 = scmp.lt.u32.totalorder %s502_s25, %s608_s0 }
  0x17   : > { %p331_p4 = pnand %p330_p3, %p329_p2  ;;  %p335_p8 = scmp.lt.u32.totalorder %s333_s4, %s328_s30 }
  0x18   : > { %p337_p9 = scmp.lt.u32.totalorder %s328_s30, %s502_s25 }
  0x19   : > { %p332_p7 = pneg %p331_p4  ;;  %p336_p10 = por %p335_p8, %p334_p5 }
  0x1b   : > { %p338_p0 = por %p337_p9, %p336_p10 }
  0x1d   : > { %p339_p1 = pnand %p338_p0, %p332_p7 }
  0x1f   : > { %342 = shalt.err (!%p339_p1)
}
  0x20   : > { %s343_s13 = scalar_lea.vmem %s510_s27, 128  ;;  %s426_s14 = smov [#allocation2]  }
  0x21   : > { %p344_p2 = scmp.ne.s32.totalorder %s510_s27, %s343_s13  ;;  %s348_s16 = sshll.u32 %s426_s14, 4  ;;  %s349_s16 = int_to_ptr.vmem [resolvable:$false] %s348_s16 }
  0x22   : > { %s350_s20 = scalar_lea.vmem %s349_s16, 256  ;;  %p351_p11 = scmp.lt.s32.totalorder %s510_s27, %s349_s16 }
  0x23   : > { %p346_p4 = pnand %p344_p2, %p330_p3  ;;  %p352_p5 = scmp.lt.s32.totalorder %s350_s20, %s343_s13 }
  0x25   : > { %p347_p12 = pneg %p346_p4  ;;  %p353_p8 = por %p352_p5, %p351_p11 }
  0x27   : > { %p354_p9 = pnand %p353_p8, %p347_p12 }
  0x29   : > { %357 = shalt.err (!%p354_p9)
}
  0x2a   : > { %283 = dma.hbm_to_vmem [thread:$0]  (!%p506_p13), %s502_s25, 128, %s510_s27, %s88_s29  }
  0x2b   : > { %p616_p0 = scmp.lt.s32.totalorder %s424_s9, 3  ;;  %p617_p1 = scmp.ge.s32.totalorder %s424_s9, 1 }
  0x2d   : > { %p105_p3 = pnand %p617_p1, %p616_p0 }
  0x2e   : > { %s544_s21 = sand.u32 (!%p105_p3), 1, %s416_s7  }
  0x2f   : > { %108 = sbr.rel (%p105_p3) target bundleno = 279 (0x117), region = 24  ;;  %s267_s22 = sshll.u32 (!%p105_p3), %s544_s21, 3 }
  0x30   : > { %s111_s23 = scalar_lea.sflag (!%p105_p3), [#allocation3], %s544_s21  ;;  %s114_s24 = scalar_lea.vmem (!%p105_p3), [#allocation2], %s267_s22 }
  0x36   : > { %403 = dma.done.wait (%p482_p6), %s111_s23, 128  }
  0x37   : > { %405 = vsyncadd (%p482_p6), %s111_s23, 4294967168  ;;  %vm137_vm0 = vcmask 1043456   ;;  %v133_v0 = vld [vmem:[%s114_s24] sm:$0xff]  ;;  %v427_v24 = vmov 839922192   ;;  %v168_v26 = vlaneseq  ;;  %s275_s17 = sshll.u32 %s460_s10, 7 }
  0x38   : > { %v135_v1 = vcombine.high %v133_v0, %v133_v0  ;;  %v138_v2 = vsel %vm137_vm0, %v133_v0, 0.0  ;;  %v166_v25 = vunpack.c.l.s4 %v427_v24  ;;  %s132_s25 = scalar_lea.vmem [#allocation5], %s267_s22  ;;  %s564_s29 = scalar_lea.hbm %s609_s1, %s275_s17 }
  0x39   : > { %v169_v28 = vshrl.u32 %v168_v26, 7  ;;  %s190_s26 = sshll.u32 %s132_s25, 4  ;;  %s176_s30 = scalar_lea.sflag [#allocation4], %s544_s21  ;;  %s566_s26 = int_to_ptr.vmem [resolvable:$true] %s190_s26 }
  0x3a   : > { %v139_v3 = vsel %vm137_vm0, %v135_v1, 0.0  ;;  %v167_v27 = vunpack.c.0.s8 %v166_v25  ;;  %s358_s2 = scalar_lea.vmem %s566_s26, 128  ;;  %p618_p11 = scmp.ne.s32.totalorder %s613_s18, 0 }
  0x3b   : > { %v140_v4 = vadd.f32 %v139_v3, %v138_v2  ;;  %p359_p6 = scmp.ne.s32.totalorder %s566_s26, %s358_s2  ;;  %s428_s10 = smov [#allocation5]  }
  0x3c   : > { %v170_v31 = vsub.s32 %v167_v27, %v169_v28  ;;  %s362_s3 = sshll.u32 %s428_s10, 4  ;;  %s363_s3 = int_to_ptr.vmem [resolvable:$false] %s362_s3 }
  0x3d   : > { %141 = vadd.xlane.f32.xlu0 %v140_v4  ;;  %p360_p12 = pnand %p359_p6, %p618_p11  ;;  %s364_s4 = scalar_lea.vmem %s363_s3, 256 }
  0x3e   : > { %p365_p7 = scmp.lt.s32.totalorder %s566_s26, %s363_s3  ;;  %p366_p10 = scmp.lt.s32.totalorder %s364_s4, %s358_s2 }
  0x3f   : > { %p361_p13 = pneg %p360_p12 }
  0x40   : > { %p367_p2 = por %p366_p10, %p365_p7 }
  0x42   : > { %p368_p4 = pnand %p367_p2, %p361_p13 }
  0xca   : > { %v142_v5 = vpop.xlane.xlu0 %141 }
  0xcb   : > { %v143_v6 = vmul.f32 0.00390625, %v142_v5 }
  0xcd   : > { %v144_v7 = vsel %vm137_vm0, %v143_v6, -inf }
  0xce   : > { %v145_v8 = vrot.slane %v144_v7, 4 }
  0xd0   : > { %v146_v9 = vmax.f32 %v144_v7, %v145_v8 }
  0xd2   : > { %v147_v10 = vrot.slane %v146_v9, 2 }
  0xd4   : > { %v148_v11 = vmax.f32 %v146_v9, %v147_v10 }
  0xd6   : > { %v149_v12 = vrot.slane %v148_v11, 1 }
  0xd8   : > { %v150_v13 = vmax.f32 %v148_v11, %v149_v12 }
  0xda   : > { %v151_v14 = vsub.f32 %v143_v6, %v150_v13 }
  0xdc   : > { %v152_v15 = vmul.f32 1.442695, %v151_v14 }
  0xde   : > { %324 = vpow2.f32 %v152_v15 }
  0xe8   : > { %v325_v16 = vpop.eup %324 }
  0xe9   : > { %v154_v17 = vsel %vm137_vm0, %v325_v16, 0.0 }
  0xea   : > { %v155_v18 = vrot.slane %v154_v17, 4 }
  0xec   : > { %v156_v19 = vadd.f32 %v155_v18, %v154_v17 }
  0xee   : > { %v157_v20 = vrot.slane %v156_v19, 2 }
  0xf0   : > { %v158_v21 = vadd.f32 %v157_v20, %v156_v19 }
  0xf2   : > { %v159_v22 = vrot.slane %v158_v21, 1 }
  0xf4   : > { %v160_v23 = vadd.f32 %v159_v22, %v158_v21 }
  0xf6   : > { %326 = vrcp.f32 %v160_v23 }
 0x100   : > { %v327_v29 = vpop.eup %326 }
 0x101   : > { %v162_v30 = vmul.f32 %v327_v29, %v325_v16 }
 0x103   : > { %v163_v32 = vadd.f32 1.0, %v162_v30 }
 0x105   : > { %v171_v33 = vrot.slane %v163_v32, %v170_v31 }
 0x107   : > { %v173_v34 = vmul.f32 %v171_v33, %v133_v0 }
 0x109   : > { %174 = vst [vmem:[%s132_s25] sm:$0xff] %v173_v34 }
 0x10a   : > { %371 = shalt.err (!%p368_p4)
}
 0x10b   : > { %s372_s5 = scalar_lea.hbm %s564_s29, 128  ;;  %s376_s14 = scalar_lea.hbm %s609_s1, 256 }
 0x10c   : > { %p373_p5 = scmp.ne.s32.totalorder %s564_s29, %s372_s5  ;;  %p377_p0 = scmp.lt.u32.totalorder %s564_s29, %s609_s1 }
 0x10d   : > { %p378_p1 = scmp.lt.u32.totalorder %s376_s14, %s372_s5  ;;  %p380_p6 = scmp.lt.u32.totalorder %s372_s5, %s564_s29 }
 0x10e   : > { %p374_p8 = pnand %p373_p5, %p618_p11 }
 0x10f   : > { %p379_p3 = por %p378_p1, %p377_p0 }
 0x110   : > { %p375_p9 = pneg %p374_p8 }
 0x111   : > { %p381_p12 = por %p380_p6, %p379_p3 }
 0x113   : > { %p382_p13 = pnand %p381_p12, %p375_p9 }
 0x115   : > { %385 = shalt.err (!%p382_p13)
}
 0x116   : > { %278 = dma.vmem_to_hbm [thread:$0]  (%p618_p11), %s566_s26, 128, %s564_s29, %s176_s30  }
 0x117 PF: > { %s202_s21 = sand.u32 1, %s412_s6   ;;  %p619_p7 = scmp.ne.s32.totalorder %s614_s19, 0 }
 0x118   : > { %p620_p10 = scmp.ge.s32.totalorder %s424_s9, 2  ;;  %s203_s22 = scalar_lea.sflag [#allocation4], %s202_s21 }
 0x11a   : > { %p285_p2 = pnand %p620_p10, %p619_p7 }
 0x11c   : > { %407 = dma.done.wait (!%p285_p2), %s203_s22, 128  }
 0x11d   : > { %409 = vsyncadd (!%p285_p2), %s203_s22, 4294967168  ;;  %p14_p4 = scmp.ge.s32.totalorder %s464_s12, 4   ;;  %s621_s6 = smov %s416_s7 }
 0x11e   : > { %s622_s7 = smov %s420_s8  ;;  %s623_s8 = smov %s476_s15 }
 0x11f   : > { %s624_s9 = smov %s464_s12  ;;  %16 = sbr.rel (!%p14_p4) target bundleno = 5 (0x5), region = 69 }
 0x126   :  { %208 = vsyncpa [#allocation3], 1 }
 0x127   :  { %210 = vsyncpa [#allocation3 + $0x1], 1 }
 0x128   :  { %211 = vsyncpa [#allocation4], 1 }
 0x129   :  { %213 = vsyncpa [#allocation4 + $0x1], 1 }

</bundles_post_ra>
